<compile_context>
chip_gen: v6e
topology: v6e:2x2x1
jax: 0.10.0
libtpu: 0.0.40
codegen_flags: <defaults>
</compile_context>

<pallas_src>
import math
import functools

import jax
import jax.numpy as jnp
import numpy as np
from jax.experimental import pallas as pl
from jax.experimental.pallas import tpu as pltpu


_SKIP, _FULL, _BOUNDARY = 0, 1, 2


def _mse_hinge_kernel(cls_ref, *refs, exp_weighted):
    if exp_weighted:
        tc_ref, tr_ref, rc_ref, aj_ref, wc_ref, wr_ref, out_ref = refs
    else:
        tc_ref, tr_ref, rc_ref, aj_ref, out_ref = refs

    ri = pl.program_id(0)
    cj = pl.program_id(1)
    n_col = pl.num_programs(1)
    tile_cls = cls_ref[ri * n_col + cj]   # 0=skip, 1=full (no mask), 2=boundary

    # Zero this row-tile's accumulator at the first column step.
    @pl.when(cj == 0)
    def _():
        out_ref[...] = jnp.zeros_like(out_ref)

    def accumulate(apply_mask):
        rc = rc_ref[...]          # (TM, 1)  a1*(m + in[i]) + a2*(in[i]-tg[i])^2
        aj = aj_ref[...]          # (1, TN)  a1*in[j]
        x = rc - aj               # a1*(m - (in[j]-in[i])) + a2*(in[i]-tg[i])^2
        if exp_weighted:
            x = (wc_ref[...] * wr_ref[...]) * x   # (e^tg_i - 1)(e^tg_j - 1) * x
        x = jnp.maximum(x, 0.0)                   # x[x < 0] = 0
        if apply_mask:
            # Strict tg[j] > tg[i]; +/-inf padding excludes padded pairs here
            # (comparison-driven select, never a multiply -> no NaN path).
            x = jnp.where(tr_ref[...] > tc_ref[...], x, 0.0)
        tm_, tn_ = x.shape
        # Reduce the tile to an (8, TN) partial with element-wise VPU adds only
        # (no cross-lane/XLU work inside the hot loop).
        partial = jnp.sum(x.reshape(tm_ // 8, 8, tn_), axis=0)
        out_ref[...] += partial[None]

    @pl.when(tile_cls == _FULL)      # every pair strictly valid: no mask needed
    def _():
        accumulate(apply_mask=False)

    @pl.when(tile_cls == _BOUNDARY)  # mixed tile: keep the compare+select
    def _():
        accumulate(apply_mask=True)
    # tile_cls == _SKIP: no pair in this tile satisfies tg[j] > tg[i]; do nothing.


def _round_up(x, m):
    return ((x + m - 1) // m) * m


def _pick_tiles(N, tm, tn):
    assert tm >= 8 and tm % 8 == 0 and (tm & (tm - 1)) == 0, \
        "tm must be a power of two >= 8"
    assert tn >= 128 and tn % 128 == 0, "tn must be a multiple of 128"
    np128 = max(128, _round_up(N, 128))
    TN = min(tn, np128)              # multiple of 128
    Np = _round_up(np128, TN)        # multiple of TN (and of 128)
    TM = tm
    # TM must divide Np; also aim for >= 2 row tiles so the "parallel" row axis
    # can actually feed both TensorCores on v7x.
    while TM > 8 and (Np % TM != 0 or Np // TM < 2):
        TM //= 2
    assert TM % 8 == 0 and Np % TM == 0 and Np % TN == 0
    return TM, TN, Np


def mse_hinge_loss(inp, tgt, *, m=0.01, alpha1=0.5, alpha2=0.5,
                   exp_weighted=False, tm=512, tn=2048):
    """Pallas implementation of MSEHingeLoss.forward(input, target)."""
    assert inp.shape == tgt.shape and inp.ndim == 1
    N = inp.shape[0]

    inp = inp.astype(jnp.float32)
    tgt = tgt.astype(jnp.float32)

    # The pairwise loss is permutation invariant: sort by target so whole
    # (row, col) tiles can be skipped / un-masked from per-tile target bounds.
    order = jnp.argsort(tgt)
    inp = inp[order]
    tgt = tgt[order]

    TM, TN, Np = _pick_tiles(N, tm, tn)
    pad = Np - N
    n_row, n_col = Np // TM, Np // TN

    # Hoisted O(N) precomputation (wrapper-side, off the O(N^2) path).
    rc = alpha1 * (m + inp) + alpha2 * (inp - tgt) ** 2
    aj = alpha1 * inp

    rc_col = jnp.pad(rc, (0, pad))[:, None]                        # (Np, 1)
    aj_row = jnp.pad(aj, (0, pad))[None, :]                        # (1, Np)
    tc_pad = jnp.pad(tgt, (0, pad), constant_values=jnp.inf)       # i-side pads
    tr_pad = jnp.pad(tgt, (0, pad), constant_values=-jnp.inf)      # j-side pads
    tc_col = tc_pad[:, None]                                       # (Np, 1)
    tr_row = tr_pad[None, :]                                       # (1, Np)

    # Per-tile class table (skip / full / boundary), scalar-prefetched to SMEM.
    row_min = tc_pad.reshape(n_row, TM).min(axis=1)  # +inf pads ignored by min
    row_max = tc_pad.reshape(n_row, TM).max(axis=1)  # +inf if row tile padded
    col_min = tr_pad.reshape(n_col, TN).min(axis=1)  # -inf if col tile padded
    col_max = tr_pad.reshape(n_col, TN).max(axis=1)  # -inf pads ignored by max
    skip = col_max[None, :] <= row_min[:, None]      # no pair has tg[j] > tg[i]
    full = col_min[None, :] > row_max[:, None]       # every pair strictly valid
    cls = jnp.where(skip, _SKIP, jnp.where(full, _FULL, _BOUNDARY))
    cls = cls.astype(jnp.int32).reshape(-1)          # (n_row * n_col,) -> SMEM

    col_spec = pl.BlockSpec((TM, 1), lambda i, j, c: (i, 0))
    row_spec = pl.BlockSpec((1, TN), lambda i, j, c: (0, j))

    args = [tc_col, tr_row, rc_col, aj_row]
    in_specs = [col_spec, row_spec, col_spec, row_spec]
    if exp_weighted:
        w = jnp.pad(jnp.exp(tgt) - 1.0, (0, pad))
        args += [w[:, None], w[None, :]]
        in_specs += [col_spec, row_spec]
        scale = 2.0 / (N * (math.e - 1.0)) ** 2
    else:
        scale = 2.0 / N ** 2

    kernel = functools.partial(_mse_hinge_kernel, exp_weighted=exp_weighted)

    partials = pl.pallas_call(
        kernel,
        out_shape=jax.ShapeDtypeStruct((n_row, 8, TN), jnp.float32),
        grid_spec=pltpu.PrefetchScalarGridSpec(
            num_scalar_prefetch=1,
            grid=(n_row, n_col),
            in_specs=in_specs,
            out_specs=pl.BlockSpec((1, 8, TN), lambda i, j, c: (i, 0, 0)),
        ),
        compiler_params=pltpu.CompilerParams(
            dimension_semantics=("parallel", "arbitrary"),
            vmem_limit_bytes=48 * 1024 * 1024),
    )(cls, *args)

    # Single cheap cross-lane reduction on the tiny partial array.
    return scale * jnp.sum(partials)


def _reference_loss(inp, tgt, m=0.01, alpha1=0.5, alpha2=0.5,
                    exp_weighted=False):
    """Direct numpy port of the PyTorch forward, for verification."""
    inp = np.asarray(inp, np.float64)
    tgt = np.asarray(tgt, np.float64)
    N = inp.shape[0]
    total = 0.0
    for i in range(N):
        idx = tgt > tgt[i]
        x = alpha1 * (m - (inp[idx] - inp[i])) + alpha2 * (inp[i] - tgt[i]) ** 2
        if exp_weighted:
            x = (np.exp(tgt[i]) - 1.0) * (np.exp(tgt[idx]) - 1.0) * x
        x = np.where(x < 0, 0.0, x)
        total += x.sum()
    if exp_weighted:
        return 2.0 / (N * (math.e - 1.0)) ** 2 * total
    return 2.0 / N ** 2 * total


if __name__ == "__main__":
    # MSEHingeLoss has no learnable parameters; inputs are 1-D score vectors.
    key = jax.random.PRNGKey(0)
    k_in, k_tg = jax.random.split(key)

    # Small case (padded single-column grid), both branches.
    N = 8
    inp = jax.random.normal(k_in, (N,), dtype=jnp.float32)
    tgt = jax.random.normal(k_tg, (N,), dtype=jnp.float32)

    loss = jax.block_until_ready(mse_hinge_loss(inp, tgt, exp_weighted=False))
    ref = _reference_loss(np.array(inp), np.array(tgt), exp_weighted=False)
    assert np.isclose(float(loss), ref, rtol=1e-5, atol=1e-6), (float(loss), ref)

    loss_w = jax.block_until_ready(mse_hinge_loss(inp, tgt, exp_weighted=True))
    ref_w = _reference_loss(np.array(inp), np.array(tgt), exp_weighted=True)
    assert np.isclose(float(loss_w), ref_w, rtol=1e-5, atol=1e-6), (float(loss_w), ref_w)

    # Larger case with default tiles (multi row-tile grid, padding, sort).
    N2 = 600
    k_in2, k_tg2 = jax.random.split(jax.random.PRNGKey(1))
    inp2 = jax.random.normal(k_in2, (N2,), dtype=jnp.float32)
    tgt2 = jax.random.normal(k_tg2, (N2,), dtype=jnp.float32)
    loss2 = jax.block_until_ready(mse_hinge_loss(inp2, tgt2, exp_weighted=False))
    ref2 = _reference_loss(np.array(inp2), np.array(tgt2), exp_weighted=False)
    assert np.isclose(float(loss2), ref2, rtol=1e-4, atol=1e-5), (float(loss2), ref2)

    # Same data with small custom tiles to exercise a multi-(row,col) grid and
    # all three tile classes (skip / full / boundary), weighted branch too.
    loss3 = jax.block_until_ready(
        mse_hinge_loss(inp2, tgt2, exp_weighted=False, tm=128, tn=256))
    assert np.isclose(float(loss3), ref2, rtol=1e-4, atol=1e-5), (float(loss3), ref2)

    loss4 = jax.block_until_ready(
        mse_hinge_loss(inp2, tgt2, exp_weighted=True, tm=128, tn=256))
    ref4 = _reference_loss(np.array(inp2), np.array(tgt2), exp_weighted=True)
    assert np.isclose(float(loss4), ref4, rtol=1e-4, atol=1e-5), (float(loss4), ref4)

    print("KERNEL_OK")
</pallas_src>

<mosaic_0001>
module attributes {stable_mosaic.version = 11 : i64} {
  func.func @_mse_hinge_kernel(%arg0: i32, %arg1: i32, %arg2: memref<2xi32, #tpu.memory_space<smem>>, %arg3: memref<64x1xf32, #tpu.memory_space<vmem>>, %arg4: memref<1x128xf32, #tpu.memory_space<vmem>>, %arg5: memref<64x1xf32, #tpu.memory_space<vmem>>, %arg6: memref<1x128xf32, #tpu.memory_space<vmem>>, %arg7: memref<1x8x128xf32, #tpu.memory_space<vmem>>) attributes {dimension_semantics = [#tpu.dimension_semantics<parallel>, #tpu.dimension_semantics<arbitrary>], iteration_bounds = array<i64: 2, 1>, scalar_prefetch = 1 : i64, scratch_operands = 0 : i64, tpu.core_type = #tpu.core_type<tc>, window_params = [{transform_indices = @transform_0, window_bounds = array<i64: 64, 1>}, {transform_indices = @transform_1, window_bounds = array<i64: 1, 128>}, {transform_indices = @transform_2, window_bounds = array<i64: 64, 1>}, {transform_indices = @transform_3, window_bounds = array<i64: 1, 128>}, {transform_indices = @transform_4, window_bounds = array<i64: 1, 8, 128>}]} {
    %c1_i32 = arith.constant 1 : i32
    %0 = arith.muli %arg0, %c1_i32 : i32
    %1 = arith.addi %0, %arg1 : i32
    %2 = arith.index_cast %1 : i32 to index
    %3 = memref.load %arg2[%2] : memref<2xi32, #tpu.memory_space<smem>>
    %c0_i32 = arith.constant 0 : i32
    %4 = arith.cmpi eq, %arg1, %c0_i32 : i32
    %5 = arith.extui %4 : i1 to i32
    %c0_i32_0 = arith.constant 0 : i32
    %6 = arith.cmpi ne, %5, %c0_i32_0 : i32
    scf.if %6 {
      %cst = arith.constant 0.000000e+00 : f32
      %13 = vector.broadcast %cst : f32 to vector<1x8x128xf32>
      %c0 = arith.constant 0 : index
      %c0_4 = arith.constant 0 : index
      %c0_5 = arith.constant 0 : index
      %14 = vector.load %arg7[%c0, %c0_4, %c0_5] : memref<1x8x128xf32, #tpu.memory_space<vmem>>, vector<1x8x128xf32>
      tpu.vector_store %arg7[%c0, %c0_4, %c0_5], %13 {strides = array<i32>} : memref<1x8x128xf32, #tpu.memory_space<vmem>>, vector<1x8x128xf32>,
    } else {
    }
    %c1_i32_1 = arith.constant 1 : i32
    %7 = arith.cmpi eq, %3, %c1_i32_1 : i32
    %8 = arith.extui %7 : i1 to i32
    %c0_i32_2 = arith.constant 0 : i32
    %9 = arith.cmpi ne, %8, %c0_i32_2 : i32
    scf.if %9 {
      %c0 = arith.constant 0 : index
      %c0_4 = arith.constant 0 : index
      %13 = vector.load %arg5[%c0, %c0_4] : memref<64x1xf32, #tpu.memory_space<vmem>>, vector<64x1xf32>
      %c0_5 = arith.constant 0 : index
      %c0_6 = arith.constant 0 : index
      %14 = vector.load %arg6[%c0_5, %c0_6] : memref<1x128xf32, #tpu.memory_space<vmem>>, vector<1x128xf32>
      %15 = vector.broadcast %13 : vector<64x1xf32> to vector<64x128xf32>
      %16 = vector.broadcast %14 : vector<1x128xf32> to vector<64x128xf32>
      %17 = arith.subf %15, %16 : vector<64x128xf32>
      %cst = arith.constant 0.000000e+00 : f32
      %18 = vector.broadcast %cst : f32 to vector<64x128xf32>
      %19 = arith.maximumf %17, %18 : vector<64x128xf32>
      %20 = vector.shape_cast %19 : vector<64x128xf32> to vector<8x8x128xf32>
      %cst_7 = arith.constant dense<0.000000e+00> : vector<8x128xf32>
      %21 = vector.multi_reduction <add>, %20, %cst_7 [0] : vector<8x8x128xf32> to vector<8x128xf32>
      %c0_8 = arith.constant 0 : index
      %c0_9 = arith.constant 0 : index
      %c0_10 = arith.constant 0 : index
      %22 = vector.load %arg7[%c0_8, %c0_9, %c0_10] : memref<1x8x128xf32, #tpu.memory_space<vmem>>, vector<1x8x128xf32>
      %23 = vector.shape_cast %21 : vector<8x128xf32> to vector<1x8x128xf32>
      %24 = arith.addf %22, %23 : vector<1x8x128xf32>
      %c0_11 = arith.constant 0 : index
      %c0_12 = arith.constant 0 : index
      %c0_13 = arith.constant 0 : index
      %25 = vector.load %arg7[%c0_11, %c0_12, %c0_13] : memref<1x8x128xf32, #tpu.memory_space<vmem>>, vector<1x8x128xf32>
      tpu.vector_store %arg7[%c0_11, %c0_12, %c0_13], %24 {strides = array<i32>} : memref<1x8x128xf32, #tpu.memory_space<vmem>>, vector<1x8x128xf32>,
    } else {
    }
    %c2_i32 = arith.constant 2 : i32
    %10 = arith.cmpi eq, %3, %c2_i32 : i32
    %11 = arith.extui %10 : i1 to i32
    %c0_i32_3 = arith.constant 0 : i32
    %12 = arith.cmpi ne, %11, %c0_i32_3 : i32
    scf.if %12 {
      %c0 = arith.constant 0 : index
      %c0_4 = arith.constant 0 : index
      %13 = vector.load %arg5[%c0, %c0_4] : memref<64x1xf32, #tpu.memory_space<vmem>>, vector<64x1xf32>
      %c0_5 = arith.constant 0 : index
      %c0_6 = arith.constant 0 : index
      %14 = vector.load %arg6[%c0_5, %c0_6] : memref<1x128xf32, #tpu.memory_space<vmem>>, vector<1x128xf32>
      %15 = vector.broadcast %13 : vector<64x1xf32> to vector<64x128xf32>
      %16 = vector.broadcast %14 : vector<1x128xf32> to vector<64x128xf32>
      %17 = arith.subf %15, %16 : vector<64x128xf32>
      %cst = arith.constant 0.000000e+00 : f32
      %18 = vector.broadcast %cst : f32 to vector<64x128xf32>
      %19 = arith.maximumf %17, %18 : vector<64x128xf32>
      %c0_7 = arith.constant 0 : index
      %c0_8 = arith.constant 0 : index
      %20 = vector.load %arg4[%c0_7, %c0_8] : memref<1x128xf32, #tpu.memory_space<vmem>>, vector<1x128xf32>
      %c0_9 = arith.constant 0 : index
      %c0_10 = arith.constant 0 : index
      %21 = vector.load %arg3[%c0_9, %c0_10] : memref<64x1xf32, #tpu.memory_space<vmem>>, vector<64x1xf32>
      %22 = vector.broadcast %20 : vector<1x128xf32> to vector<64x128xf32>
      %23 = vector.broadcast %21 : vector<64x1xf32> to vector<64x128xf32>
      %24 = arith.cmpf ogt, %22, %23 : vector<64x128xf32>
      %cst_11 = arith.constant 0.000000e+00 : f32
      %25 = vector.broadcast %cst_11 : f32 to vector<64x128xf32>
      %26 = arith.select %24, %19, %25 : vector<64x128xi1>, vector<64x128xf32>
      %27 = vector.shape_cast %26 : vector<64x128xf32> to vector<8x8x128xf32>
      %cst_12 = arith.constant dense<0.000000e+00> : vector<8x128xf32>
      %28 = vector.multi_reduction <add>, %27, %cst_12 [0] : vector<8x8x128xf32> to vector<8x128xf32>
      %c0_13 = arith.constant 0 : index
      %c0_14 = arith.constant 0 : index
      %c0_15 = arith.constant 0 : index
      %29 = vector.load %arg7[%c0_13, %c0_14, %c0_15] : memref<1x8x128xf32, #tpu.memory_space<vmem>>, vector<1x8x128xf32>
      %30 = vector.shape_cast %28 : vector<8x128xf32> to vector<1x8x128xf32>
      %31 = arith.addf %29, %30 : vector<1x8x128xf32>
      %c0_16 = arith.constant 0 : index
      %c0_17 = arith.constant 0 : index
      %c0_18 = arith.constant 0 : index
      %32 = vector.load %arg7[%c0_16, %c0_17, %c0_18] : memref<1x8x128xf32, #tpu.memory_space<vmem>>, vector<1x8x128xf32>
      tpu.vector_store %arg7[%c0_16, %c0_17, %c0_18], %31 {strides = array<i32>} : memref<1x8x128xf32, #tpu.memory_space<vmem>>, vector<1x8x128xf32>,
    } else {
    }
    return
  }
  func.func @transform_0(%arg0: i32, %arg1: i32, %arg2: memref<2xi32, #tpu.memory_space<smem>>) -> (i32, i32) {
    %c0_i32 = arith.constant 0 : i32
    %c0_i32_0 = arith.constant 0 : i32
    return %arg0, %c0_i32 : i32, i32
  }
  func.func @transform_1(%arg0: i32, %arg1: i32, %arg2: memref<2xi32, #tpu.memory_space<smem>>) -> (i32, i32) {
    %c0_i32 = arith.constant 0 : i32
    %c0_i32_0 = arith.constant 0 : i32
    return %c0_i32, %arg1 : i32, i32
  }
  func.func @transform_2(%arg0: i32, %arg1: i32, %arg2: memref<2xi32, #tpu.memory_space<smem>>) -> (i32, i32) {
    %c0_i32 = arith.constant 0 : i32
    %c0_i32_0 = arith.constant 0 : i32
    return %arg0, %c0_i32 : i32, i32
  }
  func.func @transform_3(%arg0: i32, %arg1: i32, %arg2: memref<2xi32, #tpu.memory_space<smem>>) -> (i32, i32) {
    %c0_i32 = arith.constant 0 : i32
    %c0_i32_0 = arith.constant 0 : i32
    return %c0_i32, %arg1 : i32, i32
  }
  func.func @transform_4(%arg0: i32, %arg1: i32, %arg2: memref<2xi32, #tpu.memory_space<smem>>) -> (i32, i32, i32) {
    %c0_i32 = arith.constant 0 : i32
    %c0_i32_0 = arith.constant 0 : i32
    %c0_i32_1 = arith.constant 0 : i32
    return %arg0, %c0_i32, %c0_i32_0 : i32, i32, i32
  }
}

</mosaic_0001>

<bundles_post_ra>
// kernel: tpu_custom_call.1
= control target key start
LH: loop header
LB: loop body
LE: loop exit
PB: predicated region body
PF: predicated region fallthrough
CT: control target
= control target key end

     0   :  { %s1001_s0 = inlined_call_operand.vmem [shape: s32[2], index: 0, kind: input, shape index: {}]   ;;  %s1002_s1 = inlined_call_operand.vmem [shape: f32[128,1], index: 1, kind: input, shape index: {}]   ;;  %s1003_s2 = inlined_call_operand.vmem [shape: f32[1,128], index: 2, kind: input, shape index: {}]   ;;  %s1004_s3 = inlined_call_operand.vmem [shape: f32[128,1], index: 3, kind: input, shape index: {}]   ;;  %s1005_s4 = inlined_call_operand.vmem [shape: f32[1,128], index: 4, kind: input, shape index: {}]   ;;  %s1006_s5 = inlined_call_operand.hbm [shape: f32[2,8,128], index: 5, kind: output, shape index: {}]  }
   0x1   :  { %s10_s20 = sshll.u32 %s1001_s0, 4  ;;  %s11_s20 = int_to_ptr.vmem [resolvable:$true] %s10_s20 }
   0x2   :  { %s716_s21 = scalar_lea.vmem %s11_s20, 16  ;;  %p721_p1 = scmp.lt.s32.totalorder %s11_s20, %s11_s20 }
   0x3   :  { %p717_p0 = scmp.ne.s32.totalorder %s11_s20, %s716_s21  ;;  %p722_p2 = scmp.lt.s32.totalorder %s716_s21, %s716_s21 }
   0x5   :  { %p723_p3 = por %p722_p2, %p721_p1 }
   0x7   :  { %p724_p4 = pnand %p723_p3, %p717_p0 }
   0x9   :  { %727 = shalt.err (!%p724_p4)  }
   0xa   :  { %s808_s22 = smov [#allocation3]  }
   0xb   :  { %13 = dma.vmem_to_smem %s11_s20, 16, %s808_s22, [#allocation2] }
   0xc   :  { %778 = dma.done.wait [#allocation2], 16 }
   0xd   :  { %779 = vsyncadd [#allocation2], 4294967280 }
   0xe   :  { %15 = sfence }
   0xf   :  { %16 = vsyncpa [#allocation5], 0 }
  0x10   :  { %18 = vsyncpa [#allocation5 + $0x1], 0  ;;  %s846_s23 = smov 0   ;;  %s848_s24 = smov 0  }
  0x11   :  { %s850_s0 = smov 0   ;;  %s852_s25 = smov 0  }
  0x12   :  { %s854_s26 = smov 0   ;;  %s856_s27 = smov 0  }
  0x13 LB: > { %s632_s28 = sadd.s32 4294967295, %s806_s27   ;;  %s633_s29 = sadd.s32 4294967294, %s806_s27   ;;  %s806_s27 = sphi %s856_s27, %s24_s27   ;;  %s802_s26 = sphi %s854_s26, %s1013_s26   ;;  %s798_s25 = sphi %s852_s25, %s1012_s25   ;;  %s794_s0 = sphi %s850_s0, %s1011_s0   ;;  %s790_s24 = sphi %s848_s24, %s1010_s24   ;;  %s786_s23 = sphi %s846_s23, %s1009_s23  }
  0x14   : > { %s36_s30 = sadd.s32 1, %s802_s26  ;;  %s147_s6 = sadd.s32 1, %s794_s0 }
  0x15   : > { %p38_p5 = scmp.ge.s32.totalorder %s36_s30, 2  ;;  %p157_p6 = scmp.ne.s32.totalorder %s794_s0, %s790_s24 }
  0x16   : > { %p158_p7 = scmp.eq.s32.totalorder %s632_s28, 1  ;;  %p163_p8 = scmp.ne.s32.totalorder %s790_s24, %s786_s23 }
  0x17   : > { %s1015_s30 = smov (%p38_p5, %s36_s30), 0  ;;  %p164_p10 = scmp.eq.s32.totalorder %s633_s29, 1 }
  0x18   : > { %p886_p9 = por %p158_p7, %p157_p6  ;;  %s144_s8 = ssub.s32 %s802_s26, %s1015_s30 }
  0x19   : > { %p638_p11 = scmp.ge.s32.totalorder %s806_s27, 1  ;;  %p145_p12 = scmp.eq.s32.totalorder %s144_s8, 0 }
  0x1a   : > { %p893_p13 = por %p164_p10, %p163_p8  ;;  %p212_p0 = scmp.lt.s32.totalorder %s806_s27, 3 }
  0x1b   : > { %s899_s10 = scalar_select %p145_p12, %s794_s0, %s147_s6  }
  0x1c   : > { %p213_p1 = pnand %p638_p11, %p212_p0 }
  0x1d   : > { %s246_s11 = sand.u32 (!%p213_p1), 1, %s790_s24   ;;  %s640_s12 = sshll.u32 (!%p213_p1), %s798_s25, 3 }
  0x1e   : > { %216 = sbr.rel (%p213_p1) target bundleno = 389 (0x185), region = 36  ;;  %s639_s13 = sshll.u32 (!%p213_p1), %s246_s11, 3 }
  0x1f   : > { %p250_p2 = scmp.lt.s32.totalorder (!%p213_p1), %s640_s12, 15  ;;  %s906_s14 = sld [smem:[#allocation3 + %s798_s25]] (!%p213_p1) }
  0x20   : > { %s908_s15 = scalar_lea.vmem (!%p213_p1), [#allocation4], %s639_s13 }
  0x23   : > { %s1017_s12 = smov (!%p250_p2, %s640_s12), 15  ;;  %v809_v0 = vmov 0.0  }
  0x24   : > { %273 = vst [vmem:[%s908_s15] sm:$0xff] %v809_v0  ;;  %s641_s16 = sshll.u32 %s1017_s12, 3 }
  0x25   : > { %s914_s19 = scalar_lea.vmem %s1002_s1, %s641_s16  ;;  %s919_s22 = scalar_lea.vmem %s1004_s3, %s641_s16 }
  0x26   : > { %p644_p3 = scmp.ne.s32.totalorder %s906_s14, 1 }
  0x28   : > { %277 = sbr.rel (%p644_p3) target bundleno = 196 (0xc4), region = 44 }
  0x2d   : > { %v280_v1 = vld [vmem:[%s919_s22 + $0x10] sm:$0xff]  ;;  %v278_v2 = vld [vmem:[%s919_s22] sm:$0xff]  ;;  %v810_v3 = vmov 0   ;;  %v281_v4 = vld [vmem:[%s919_s22 + $0x18] sm:$0xff] }
  0x2e   : > { %713 = vset.pattern.permute.xlu1 %v810_v3  ;;  %712 = vset.pattern.permute.xlu0 %v810_v3  ;;  %v279_v5 = vld [vmem:[%s919_s22 + $0x8] sm:$0xff]  ;;  %v282_v7 = vld [vmem:[%s919_s22 + $0x20] sm:$0xff]  ;;  %v285_v8 = vld [vmem:[%s919_s22 + $0x38] sm:$0xff] }
  0x2f   : > { %299 = vperm.xlu1 %713, %v280_v1   ;;  %289 = vperm.xlu0 %712, %v278_v2   ;;  %v283_v6 = vld [vmem:[%s919_s22 + $0x28] sm:$0xff]  ;;  %v284_v9 = vld [vmem:[%s919_s22 + $0x30] sm:$0xff]  ;;  %v645_v10 = vld [vmem:[%s1005_s4] ss:$0 sm:$0xff] }
  0x30   : > { %v356_v41 = vld [vmem:[%s908_s15] sm:$0xff] }
  0x33   : > { %304 = vperm.xlu1 %713, %v281_v4   ;;  %294 = vperm.xlu0 %712, %v279_v5  }
  0x37   : > { %314 = vperm.xlu1 %713, %v283_v6   ;;  %309 = vperm.xlu0 %712, %v282_v7  }
  0x3b   : > { %324 = vperm.xlu1 %713, %v285_v8   ;;  %319 = vperm.xlu0 %712, %v284_v9  }
  0xaa   : > { %v300_v11 = vpop.permute.xlu1 %299  ;;  %v290_v12 = vpop.permute.xlu0 %289 }
  0xab   : > { %v333_v13 = vsub.f32 %v290_v12, %v645_v10  ;;  %v335_v16 = vsub.f32 %v300_v11, %v645_v10 }
  0xad   : > { %v341_v18 = vmax.f32 %v333_v13, 0.0  ;;  %v343_v23 = vmax.f32 %v335_v16, 0.0 }
  0xae   : > { %v305_v14 = vpop.permute.xlu1 %304  ;;  %v295_v15 = vpop.permute.xlu0 %294 }
  0xaf   : > { %v334_v17 = vsub.f32 %v295_v15, %v645_v10  ;;  %v336_v19 = vsub.f32 %v305_v14, %v645_v10 }
  0xb1   : > { %v342_v20 = vmax.f32 %v334_v17, 0.0  ;;  %v344_v26 = vmax.f32 %v336_v19, 0.0 }
  0xb2   : > { %v315_v21 = vpop.permute.xlu1 %314  ;;  %v310_v22 = vpop.permute.xlu0 %309 }
  0xb3   : > { %v349_v24 = vadd.f32 %v342_v20, %v341_v18  ;;  %v337_v25 = vsub.f32 %v310_v22, %v645_v10  ;;  %v338_v28 = vsub.f32 %v315_v21, %v645_v10 }
  0xb5   : > { %v350_v27 = vadd.f32 %v349_v24, %v343_v23  ;;  %v345_v32 = vmax.f32 %v337_v25, 0.0  ;;  %v346_v34 = vmax.f32 %v338_v28, 0.0 }
  0xb6   : > { %v325_v29 = vpop.permute.xlu1 %324  ;;  %v320_v30 = vpop.permute.xlu0 %319 }
  0xb7   : > { %v351_v31 = vadd.f32 %v350_v27, %v344_v26  ;;  %v339_v33 = vsub.f32 %v320_v30, %v645_v10  ;;  %v340_v36 = vsub.f32 %v325_v29, %v645_v10 }
  0xb9   : > { %v352_v35 = vadd.f32 %v351_v31, %v345_v32  ;;  %v347_v38 = vmax.f32 %v339_v33, 0.0  ;;  %v348_v39 = vmax.f32 %v340_v36, 0.0 }
  0xbb   : > { %v353_v37 = vadd.f32 %v352_v35, %v346_v34 }
  0xbd   : > { %v354_v40 = vadd.f32 %v353_v37, %v347_v38 }
  0xbf   : > { %v355_v42 = vadd.f32 %v354_v40, %v348_v39 }
  0xc1   : > { %v357_v43 = vadd.f32 %v356_v41, %v355_v42 }
  0xc3   : > { %358 = vst [vmem:[%s908_s15] sm:$0xff] %v357_v43 }
  0xc4 PF: > { %p646_p4 = scmp.ne.s32.totalorder %s906_s14, 2 }
  0xc6   : > { %362 = sbr.rel (%p646_p4) target bundleno = 366 (0x16e), region = 48 }
  0xcb   : > { %v365_v44 = vld [vmem:[%s919_s22 + $0x10] sm:$0xff]  ;;  %v363_v45 = vld [vmem:[%s919_s22] sm:$0xff]  ;;  %v811_v46 = vmov 0   ;;  %v364_v48 = vld [vmem:[%s919_s22 + $0x8] sm:$0xff] }
  0xcc   : > { %715 = vset.pattern.permute.xlu1 %v811_v46  ;;  %714 = vset.pattern.permute.xlu0 %v811_v46  ;;  %v435_v47 = vld [vmem:[%s914_s19] sm:$0xff]  ;;  %v366_v49 = vld [vmem:[%s919_s22 + $0x18] sm:$0xff]  ;;  %v436_v50 = vld [vmem:[%s914_s19 + $0x8] sm:$0xff] }
  0xcd   : > { %384 = vperm.xlu1 %715, %v365_v44   ;;  %374 = vperm.xlu0 %714, %v363_v45   ;;  %v367_v51 = vld [vmem:[%s919_s22 + $0x20] sm:$0xff]  ;;  %v437_v52 = vld [vmem:[%s914_s19 + $0x10] sm:$0xff]  ;;  %v368_v53 = vld [vmem:[%s919_s22 + $0x28] sm:$0xff] }
  0xce   : > { %v438_v54 = vld [vmem:[%s914_s19 + $0x18] sm:$0xff]  ;;  %v369_v55 = vld [vmem:[%s919_s22 + $0x30] sm:$0xff]  ;;  %v439_v56 = vld [vmem:[%s914_s19 + $0x20] sm:$0xff] }
  0xcf   : > { %v370_v57 = vld [vmem:[%s919_s22 + $0x38] sm:$0xff]  ;;  %v440_v58 = vld [vmem:[%s914_s19 + $0x28] sm:$0xff]  ;;  %v441_v60 = vld [vmem:[%s914_s19 + $0x30] sm:$0xff] }
  0xd0   : > { %v442_v59 = vld [vmem:[%s914_s19 + $0x38] sm:$0xff]  ;;  %v647_v3 = vld [vmem:[%s1005_s4] ss:$0 sm:$0xff] }
  0xd1   : > { %451 = vperm.xlu1 %715, %v435_v47   ;;  %379 = vperm.xlu0 %714, %v364_v48   ;;  %v648_v9 = vld [vmem:[%s1003_s2] ss:$0 sm:$0xff] }
  0xd2   : > { %v512_v45 = vld [vmem:[%s908_s15] sm:$0xff] }
  0xd5   : > { %389 = vperm.xlu1 %715, %v366_v49   ;;  %456 = vperm.xlu0 %714, %v436_v50  }
  0xd9   : > { %394 = vperm.xlu1 %715, %v367_v51   ;;  %461 = vperm.xlu0 %714, %v437_v52  }
  0xdd   : > { %399 = vperm.xlu1 %715, %v368_v53   ;;  %466 = vperm.xlu0 %714, %v438_v54  }
  0xe1   : > { %404 = vperm.xlu1 %715, %v369_v55   ;;  %471 = vperm.xlu0 %714, %v439_v56  }
  0xe5   : > { %409 = vperm.xlu1 %715, %v370_v57   ;;  %476 = vperm.xlu0 %714, %v440_v58  }
  0xe9   : > { %486 = vperm.xlu1 %715, %v442_v59   ;;  %481 = vperm.xlu0 %714, %v441_v60  }
 0x148   : > { %v385_v61 = vpop.permute.xlu1 %384  ;;  %v375_v62 = vpop.permute.xlu0 %374 }
 0x149   : > { %v418_v5 = vsub.f32 %v375_v62, %v647_v3  ;;  %v420_v8 = vsub.f32 %v385_v61, %v647_v3 }
 0x14b   : > { %v426_v11 = vmax.f32 %v418_v5, 0.0  ;;  %v428_v15 = vmax.f32 %v420_v8, 0.0 }
 0x14c   : > { %v452_v63 = vpop.permute.xlu1 %451  ;;  %v380_v0 = vpop.permute.xlu0 %379 }
 0x14d   : > { %v419_v4 = vsub.f32 %v380_v0, %v647_v3  ;;  %vm489_vm1 = vcmp.gt.f32.partialorder %v648_v9, %v452_v63 }
 0x14e   : > { %v497_v18 = vsel %vm489_vm1, %v426_v11, 0.0 }
 0x14f   : > { %v427_v10 = vmax.f32 %v419_v4, 0.0 }
 0x150   : > { %v390_v1 = vpop.permute.xlu1 %389  ;;  %v457_v2 = vpop.permute.xlu0 %456 }
 0x151   : > { %vm490_vm0 = vcmp.gt.f32.partialorder %v648_v9, %v457_v2  ;;  %v421_v12 = vsub.f32 %v390_v1, %v647_v3 }
 0x152   : > { %v498_v16 = vsel %vm490_vm0, %v427_v10, 0.0 }
 0x153   : > { %v429_v19 = vmax.f32 %v421_v12, 0.0  ;;  %v505_v24 = vadd.f32 %v498_v16, %v497_v18 }
 0x154   : > { %v395_v6 = vpop.permute.xlu1 %394  ;;  %v462_v7 = vpop.permute.xlu0 %461 }
 0x155   : > { %vm491_vm2 = vcmp.gt.f32.partialorder %v648_v9, %v462_v7  ;;  %v422_v17 = vsub.f32 %v395_v6, %v647_v3 }
 0x156   : > { %v499_v20 = vsel %vm491_vm2, %v428_v15, 0.0 }
 0x157   : > { %v430_v25 = vmax.f32 %v422_v17, 0.0  ;;  %v506_v27 = vadd.f32 %v505_v24, %v499_v20 }
 0x158   : > { %v400_v13 = vpop.permute.xlu1 %399  ;;  %v467_v14 = vpop.permute.xlu0 %466 }
 0x159   : > { %vm492_vm3 = vcmp.gt.f32.partialorder %v648_v9, %v467_v14  ;;  %v423_v21 = vsub.f32 %v400_v13, %v647_v3 }
 0x15a   : > { %v500_v26 = vsel %vm492_vm3, %v429_v19, 0.0 }
 0x15b   : > { %v431_v28 = vmax.f32 %v423_v21, 0.0  ;;  %v507_v33 = vadd.f32 %v506_v27, %v500_v26 }
 0x15c   : > { %v405_v22 = vpop.permute.xlu1 %404  ;;  %v472_v23 = vpop.permute.xlu0 %471 }
 0x15d   : > { %vm493_vm4 = vcmp.gt.f32.partialorder %v648_v9, %v472_v23  ;;  %v424_v29 = vsub.f32 %v405_v22, %v647_v3 }
 0x15e   : > { %v501_v30 = vsel %vm493_vm4, %v430_v25, 0.0 }
 0x15f   : > { %v508_v36 = vadd.f32 %v507_v33, %v501_v30  ;;  %v432_v37 = vmax.f32 %v424_v29, 0.0 }
 0x160   : > { %v410_v31 = vpop.permute.xlu1 %409  ;;  %v477_v32 = vpop.permute.xlu0 %476 }
 0x161   : > { %v425_v34 = vsub.f32 %v410_v31, %v647_v3  ;;  %vm494_vm5 = vcmp.gt.f32.partialorder %v648_v9, %v477_v32 }
 0x162   : > { %v502_v35 = vsel %vm494_vm5, %v431_v28, 0.0 }
 0x163   : > { %v433_v38 = vmax.f32 %v425_v34, 0.0  ;;  %v509_v41 = vadd.f32 %v508_v36, %v502_v35 }
 0x164   : > { %v487_v39 = vpop.permute.xlu1 %486  ;;  %v482_v40 = vpop.permute.xlu0 %481 }
 0x165   : > { %vm496_vm6 = vcmp.gt.f32.partialorder %v648_v9, %v487_v39  ;;  %vm495_vm7 = vcmp.gt.f32.partialorder %v648_v9, %v482_v40 }
 0x166   : > { %v503_v42 = vsel %vm495_vm7, %v432_v37, 0.0  ;;  %v504_v44 = vsel %vm496_vm6, %v433_v38, 0.0 }
 0x167   : > { %v510_v43 = vadd.f32 %v509_v41, %v503_v42 }
 0x169   : > { %v511_v46 = vadd.f32 %v510_v43, %v504_v44 }
 0x16b   : > { %v513_v47 = vadd.f32 %v512_v45, %v511_v46 }
 0x16d   : > { %514 = vst [vmem:[%s908_s15] sm:$0xff] %v513_v47 }
 0x16e PF: > { %s650_s14 = sshll.u32 %s798_s25, 7  ;;  %s529_s19 = sshll.u32 %s908_s15, 4  ;;  %s530_s19 = int_to_ptr.vmem [resolvable:$true] %s529_s19 }
 0x16f   : > { %s527_s18 = scalar_lea.hbm %s1006_s5, %s650_s14  ;;  %s516_s20 = scalar_lea.sflag [#allocation5], %s246_s11 }
 0x170   : > { %s728_s21 = scalar_lea.vmem %s530_s19, 128  ;;  %s812_s22 = smov [#allocation4]  }
 0x171   : > { %p729_p5 = scmp.ne.s32.totalorder %s530_s19, %s728_s21  ;;  %s732_s28 = sshll.u32 %s812_s22, 4  ;;  %s733_s28 = int_to_ptr.vmem [resolvable:$false] %s732_s28 }
 0x172   : > { %s734_s29 = scalar_lea.vmem %s733_s28, 256  ;;  %p735_p8 = scmp.lt.s32.totalorder %s530_s19, %s733_s28 }
 0x173   : > { %p730_p6 = pnand %p729_p5, %p886_p9  ;;  %p736_p10 = scmp.lt.s32.totalorder %s734_s29, %s728_s21 }
 0x175   : > { %p731_p7 = pneg %p730_p6  ;;  %p737_p11 = por %p736_p10, %p735_p8 }
 0x177   : > { %p738_p12 = pnand %p737_p11, %p731_p7 }
 0x179   : > { %741 = shalt.err (!%p738_p12)
}
 0x17a   : > { %s742_s25 = scalar_lea.hbm %s527_s18, 128  ;;  %s746_s6 = scalar_lea.hbm %s1006_s5, 256 }
 0x17b   : > { %p743_p0 = scmp.ne.s32.totalorder %s527_s18, %s742_s25  ;;  %p747_p3 = scmp.lt.s32.totalorder %s527_s18, %s1006_s5 }
 0x17c   : > { %p748_p4 = scmp.lt.s32.totalorder %s746_s6, %s742_s25 }
 0x17d   : > { %p744_p1 = pnand %p743_p0, %p886_p9 }
 0x17e   : > { %p749_p5 = por %p748_p4, %p747_p3 }
 0x17f   : > { %p745_p2 = pneg %p744_p1 }
 0x181   : > { %p750_p6 = pnand %p749_p5, %p745_p2 }
 0x183   : > { %753 = shalt.err (!%p750_p6)
}
 0x184   : > { %653 = dma.vmem_to_hbm [thread:$0]  (%p886_p9), %s530_s19, 128, %s527_s18, %s516_s20  }
 0x185 PF: > { %p659_p7 = scmp.ge.s32.totalorder %s806_s27, 2  ;;  %s541_s13 = sand.u32 1, %s786_s23  }
 0x186   : > { %s542_s14 = scalar_lea.sflag [#allocation5], %s541_s13 }
 0x187   : > { %p656_p8 = pnand %p659_p7, %p893_p13 }
 0x189   : > { %p657_p10 = pneg %p656_p8 }
 0x18b   : > { %781 = dma.done.wait (%p657_p10), %s542_s14, 128  }
 0x18c   : > { %783 = vsyncadd (%p657_p10), %s542_s14, 4294967168  ;;  %s24_s27 = sadd.s32 1, %s806_s27   ;;  %s1009_s23 = smov %s790_s24 }
 0x18d   : > { %p21_p11 = scmp.ge.s32.totalorder %s24_s27, 4   ;;  %s1010_s24 = smov %s794_s0 }
 0x18e   : > { %s1011_s0 = smov %s899_s10  ;;  %s1012_s25 = smov %s802_s26 }
 0x18f   : > { %s1013_s26 = smov %s1015_s30  ;;  %23 = sbr.rel (!%p21_p11) target bundleno = 19 (0x13), region = 92 }
 0x194   :  { %547 = vsyncpa [#allocation5], 1 }
 0x195   :  { %549 = vsyncpa [#allocation5 + $0x1], 1 }

</bundles_post_ra>
